<compile_context>
chip_gen: v5e
topology: v5e:2x2
jax: 0.10.0
libtpu: 0.0.40
codegen_flags: <defaults>
</compile_context>

<pallas_src>
import jax
import jax.numpy as jnp
from jax.experimental import pallas as pl
from jax.experimental.pallas import tpu as pltpu

H, W = 8, 8                        # input spatial size (module spec)
K = 3                              # kernel size
PAD_TL = K - 1 - 1                 # k-1-padding              = 1
PAD_BR = K - 1 - 1 + 1             # k-1-padding + output_pad = 2
OH = H + PAD_TL + PAD_BR - K + 1   # 9
OW = W + PAD_TL + PAD_BR - K + 1   # 9

PITCH = H + PAD_TL + PAD_BR        # 11: padded image height/width
LANE_PACK = 128 // PITCH           # 11 images side-by-side along lanes
SUB_PACK = 2                       # 2 image bands along sublanes
ROW_PITCH = 16                     # sublane pitch per band (>= PITCH, mult of 8)
IMG_PER_STEP = LANE_PACK * SUB_PACK  # 22 images per grid step

OUT_H = SUB_PACK * ROW_PITCH       # 32  (lane/sublane-dense output slab)
OUT_W = 128
IN_H = OUT_H + 8                   # 40  (>= OUT_H + K - 1, keeps window reads in-bounds)
IN_W = 2 * OUT_W                   # 256 (>= OUT_W + K - 1)


def convt_silu_kernel(xslab_ref, w_ref, v3_ref):
    """xslab_ref: (IN_H, IN_W) VMEM slab holding 22 zero-padded 11x11 images.
    w_ref: (9,) raw (unflipped) conv-transpose weight in SMEM.
    v3_ref: (OUT_H, OUT_W) lane-dense output slab; image (band j, slot i)'s
    valid 9x9 result lives at rows [j*16, j*16+9), cols [i*11, i*11+9).
    """
    # 3x3 stationary-weight correlation over the whole packed slab.  The
    # conv-transpose weight flip is static index arithmetic on the SMEM weights.
    # Positions outside each image's valid 9x9 window hold finite garbage and
    # are simply never read back by the wrapper (cheaper than masking).
    # NOTE: 8 of the 9 window reads are lane/sublane-unaligned; pltpu.roll-based
    # shifts could move that work to the XLU, but the sliced-read form is kept
    # for robustness — at 22 images/step it is no longer the dominant cost.
    acc = jnp.zeros((OUT_H, OUT_W), jnp.float32)
    for a in range(K):
        for b in range(K):
            win = xslab_ref[a:a + OUT_H, b:b + OUT_W]
            acc = acc + win * w_ref[(K - 1 - a) * K + (K - 1 - b)]

    v1 = acc
    # sigmoid = 1 / (1 + exp(-x)): exp and approximate reciprocal both on the EUP.
    v2 = pl.reciprocal(1.0 + jnp.exp(-v1), approx=True)
    v3_ref[...] = v1 * v2
    # TODO(synk): v4 = fc1(v3) and v6 = v4 * sigmoid(v3) from the reference are
    # dead code AND shape-mismatched (v3 last dim = 9 vs fc1.in_features = 8;
    # torch itself rejects output_padding >= stride), so they are skipped.


def model_forward(x1, convt_w, fc_w, fc_b):
    """x1: (N, 1, H, W) f32 NCHW.  Returns (x1, v3) -- the module output is x1.

    v3 is (N, 9, 9): the conv-transpose + SiLU intermediate, unpacked from the
    kernel's lane/sublane-packed slabs.  If v3 is never consumed downstream the
    whole pallas_call can simply be dropped (the module's real output is x1).
    """
    del fc_w, fc_b  # dead code in the reference forward (see TODO in kernel)
    n, c, h, w = x1.shape
    assert (c, h, w) == (1, H, W)
    x = x1.reshape(n, H, W)

    n_steps = -(-n // IMG_PER_STEP)
    n_pad = n_steps * IMG_PER_STEP

    # ---- layout plumbing (pure XLA, once per call): zero-pad each image to
    # 11x11 and pack 22 images per (IN_H, IN_W) slab: 11 along lanes at an
    # 11-lane pitch, 2 bands along sublanes at a 16-row pitch.
    xp = jnp.pad(x, ((0, n_pad - n), (PAD_TL, PAD_BR), (PAD_TL, PAD_BR)))      # (n_pad, 11, 11)
    xp = xp.reshape(n_steps, SUB_PACK, LANE_PACK, PITCH, PITCH)
    xp = xp.transpose(0, 1, 3, 2, 4).reshape(n_steps, SUB_PACK, PITCH,
                                             LANE_PACK * PITCH)                # (s, 2, 11, 121)
    xp = jnp.pad(xp, ((0, 0), (0, 0), (0, ROW_PITCH - PITCH),
                      (0, IN_W - LANE_PACK * PITCH)))                          # (s, 2, 16, 256)
    xslab = xp.reshape(n_steps, SUB_PACK * ROW_PITCH, IN_W)
    xslab = jnp.pad(xslab, ((0, 0), (0, IN_H - SUB_PACK * ROW_PITCH), (0, 0))) # (s, 40, 256)

    w_flat = convt_w.reshape(K * K)      # raw (unflipped) 3x3 weights -> (9,) SMEM

    v3_slab = pl.pallas_call(
        convt_silu_kernel,
        out_shape=jax.ShapeDtypeStruct((n_steps, OUT_H, OUT_W), jnp.float32),
        grid=(n_steps,),
        in_specs=[
            pl.BlockSpec((None, IN_H, IN_W), lambda s: (s, 0, 0)),
            pl.BlockSpec(memory_space=pltpu.MemorySpace.SMEM),
        ],
        out_specs=pl.BlockSpec((None, OUT_H, OUT_W), lambda s: (s, 0, 0)),
        compiler_params=pltpu.CompilerParams(
            dimension_semantics=("parallel",)),
    )(xslab, w_flat)

    # ---- unpack the valid 9x9 window of every image.
    v = v3_slab.reshape(n_steps, SUB_PACK, ROW_PITCH, OUT_W)
    v = v[:, :, :OH, :LANE_PACK * PITCH]                                       # (s, 2, 9, 121)
    v = v.reshape(n_steps, SUB_PACK, OH, LANE_PACK, PITCH)[..., :OW]           # (s, 2, 9, 11, 9)
    v3 = v.transpose(0, 1, 3, 2, 4).reshape(n_pad, OH, OW)[:n]                 # (N, 9, 9)

    # The reference module returns x1 unchanged; v3 is exposed for inspection.
    return x1, v3


if __name__ == "__main__":
    key = jax.random.PRNGKey(0)
    k_x, k_w, k_fw, k_fb = jax.random.split(key, 4)

    N = 26  # > IMG_PER_STEP -> exercises 2 grid steps + batch-remainder padding
    x1 = jax.random.normal(k_x, (N, 1, H, W), jnp.float32)
    convt_w = jax.random.normal(k_w, (1, 1, K, K), jnp.float32) * 0.3
    fc_w = jax.random.normal(k_fw, (16, 8), jnp.float32) * 0.1   # Linear(8,16).weight
    fc_b = jnp.zeros((16,), jnp.float32)                          # Linear(8,16).bias

    out_x1, v3 = jax.jit(model_forward)(x1, convt_w, fc_w, fc_b)
    jax.block_until_ready((out_x1, v3))

    # The module output is x1 itself.
    assert jnp.array_equal(out_x1, x1)

    # Cross-check the fused conv-transpose + SiLU chain against XLA's conv.
    wflip = convt_w[:, :, ::-1, ::-1]
    v1_ref = jax.lax.conv_general_dilated(
        x1, wflip, window_strides=(1, 1),
        padding=((PAD_TL, PAD_BR), (PAD_TL, PAD_BR)),
        dimension_numbers=("NCHW", "OIHW", "NCHW"))[:, 0]          # (N, 9, 9)
    v3_ref = v1_ref * jax.nn.sigmoid(v1_ref)
    # Tolerance relaxed for pl.reciprocal(approx=True) (~2^-12 relative error).
    assert jnp.allclose(v3, v3_ref, atol=5e-3, rtol=5e-3), "kernel mismatch"

    print("KERNEL_OK")
</pallas_src>

<mosaic_0001>
module attributes {stable_mosaic.version = 11 : i64} {
  func.func @convt_silu_kernel(%arg0: i32, %arg1: memref<1x40x256xf32, #tpu.memory_space<vmem>>, %arg2: memref<9xf32, #tpu.memory_space<smem>>, %arg3: memref<1x32x128xf32, #tpu.memory_space<vmem>>) attributes {dimension_semantics = [#tpu.dimension_semantics<parallel>], iteration_bounds = array<i64: 2>, scalar_prefetch = 0 : i64, scratch_operands = 0 : i64, tpu.core_type = #tpu.core_type<tc>, window_params = [{transform_indices = @transform_0, window_bounds = array<i64: 1, 40, 256>}, {transform_indices = @transform_1, window_bounds = array<i64: 9>}, {transform_indices = @transform_2, window_bounds = array<i64: 1, 32, 128>}]} {
    %cst = arith.constant 0.000000e+00 : f32
    %0 = vector.broadcast %cst : f32 to vector<32x128xf32>
    %c0 = arith.constant 0 : index
    %c0_0 = arith.constant 0 : index
    %c0_1 = arith.constant 0 : index
    %1 = vector.load %arg1[%c0, %c0_0, %c0_1] : memref<1x40x256xf32, #tpu.memory_space<vmem>>, vector<1x32x128xf32>
    %2 = vector.shape_cast %1 : vector<1x32x128xf32> to vector<32x128xf32>
    %c8 = arith.constant 8 : index
    %3 = memref.load %arg2[%c8] : memref<9xf32, #tpu.memory_space<smem>>
    %4 = vector.broadcast %3 : f32 to vector<32x128xf32>
    %5 = arith.mulf %2, %4 : vector<32x128xf32>
    %6 = arith.addf %0, %5 : vector<32x128xf32>
    %c0_2 = arith.constant 0 : index
    %c0_3 = arith.constant 0 : index
    %c1 = arith.constant 1 : index
    %7 = vector.load %arg1[%c0_2, %c0_3, %c1] : memref<1x40x256xf32, #tpu.memory_space<vmem>>, vector<1x32x128xf32>
    %8 = vector.shape_cast %7 : vector<1x32x128xf32> to vector<32x128xf32>
    %c7 = arith.constant 7 : index
    %9 = memref.load %arg2[%c7] : memref<9xf32, #tpu.memory_space<smem>>
    %10 = vector.broadcast %9 : f32 to vector<32x128xf32>
    %11 = arith.mulf %8, %10 : vector<32x128xf32>
    %12 = arith.addf %6, %11 : vector<32x128xf32>
    %c0_4 = arith.constant 0 : index
    %c0_5 = arith.constant 0 : index
    %c2 = arith.constant 2 : index
    %13 = vector.load %arg1[%c0_4, %c0_5, %c2] : memref<1x40x256xf32, #tpu.memory_space<vmem>>, vector<1x32x128xf32>
    %14 = vector.shape_cast %13 : vector<1x32x128xf32> to vector<32x128xf32>
    %c6 = arith.constant 6 : index
    %15 = memref.load %arg2[%c6] : memref<9xf32, #tpu.memory_space<smem>>
    %16 = vector.broadcast %15 : f32 to vector<32x128xf32>
    %17 = arith.mulf %14, %16 : vector<32x128xf32>
    %18 = arith.addf %12, %17 : vector<32x128xf32>
    %c0_6 = arith.constant 0 : index
    %c1_7 = arith.constant 1 : index
    %c0_8 = arith.constant 0 : index
    %19 = vector.load %arg1[%c0_6, %c1_7, %c0_8] : memref<1x40x256xf32, #tpu.memory_space<vmem>>, vector<1x32x128xf32>
    %20 = vector.shape_cast %19 : vector<1x32x128xf32> to vector<32x128xf32>
    %c5 = arith.constant 5 : index
    %21 = memref.load %arg2[%c5] : memref<9xf32, #tpu.memory_space<smem>>
    %22 = vector.broadcast %21 : f32 to vector<32x128xf32>
    %23 = arith.mulf %20, %22 : vector<32x128xf32>
    %24 = arith.addf %18, %23 : vector<32x128xf32>
    %c0_9 = arith.constant 0 : index
    %c1_10 = arith.constant 1 : index
    %c1_11 = arith.constant 1 : index
    %25 = vector.load %arg1[%c0_9, %c1_10, %c1_11] : memref<1x40x256xf32, #tpu.memory_space<vmem>>, vector<1x32x128xf32>
    %26 = vector.shape_cast %25 : vector<1x32x128xf32> to vector<32x128xf32>
    %c4 = arith.constant 4 : index
    %27 = memref.load %arg2[%c4] : memref<9xf32, #tpu.memory_space<smem>>
    %28 = vector.broadcast %27 : f32 to vector<32x128xf32>
    %29 = arith.mulf %26, %28 : vector<32x128xf32>
    %30 = arith.addf %24, %29 : vector<32x128xf32>
    %c0_12 = arith.constant 0 : index
    %c1_13 = arith.constant 1 : index
    %c2_14 = arith.constant 2 : index
    %31 = vector.load %arg1[%c0_12, %c1_13, %c2_14] : memref<1x40x256xf32, #tpu.memory_space<vmem>>, vector<1x32x128xf32>
    %32 = vector.shape_cast %31 : vector<1x32x128xf32> to vector<32x128xf32>
    %c3 = arith.constant 3 : index
    %33 = memref.load %arg2[%c3] : memref<9xf32, #tpu.memory_space<smem>>
    %34 = vector.broadcast %33 : f32 to vector<32x128xf32>
    %35 = arith.mulf %32, %34 : vector<32x128xf32>
    %36 = arith.addf %30, %35 : vector<32x128xf32>
    %c0_15 = arith.constant 0 : index
    %c2_16 = arith.constant 2 : index
    %c0_17 = arith.constant 0 : index
    %37 = vector.load %arg1[%c0_15, %c2_16, %c0_17] : memref<1x40x256xf32, #tpu.memory_space<vmem>>, vector<1x32x128xf32>
    %38 = vector.shape_cast %37 : vector<1x32x128xf32> to vector<32x128xf32>
    %c2_18 = arith.constant 2 : index
    %39 = memref.load %arg2[%c2_18] : memref<9xf32, #tpu.memory_space<smem>>
    %40 = vector.broadcast %39 : f32 to vector<32x128xf32>
    %41 = arith.mulf %38, %40 : vector<32x128xf32>
    %42 = arith.addf %36, %41 : vector<32x128xf32>
    %c0_19 = arith.constant 0 : index
    %c2_20 = arith.constant 2 : index
    %c1_21 = arith.constant 1 : index
    %43 = vector.load %arg1[%c0_19, %c2_20, %c1_21] : memref<1x40x256xf32, #tpu.memory_space<vmem>>, vector<1x32x128xf32>
    %44 = vector.shape_cast %43 : vector<1x32x128xf32> to vector<32x128xf32>
    %c1_22 = arith.constant 1 : index
    %45 = memref.load %arg2[%c1_22] : memref<9xf32, #tpu.memory_space<smem>>
    %46 = vector.broadcast %45 : f32 to vector<32x128xf32>
    %47 = arith.mulf %44, %46 : vector<32x128xf32>
    %48 = arith.addf %42, %47 : vector<32x128xf32>
    %c0_23 = arith.constant 0 : index
    %c2_24 = arith.constant 2 : index
    %c2_25 = arith.constant 2 : index
    %49 = vector.load %arg1[%c0_23, %c2_24, %c2_25] : memref<1x40x256xf32, #tpu.memory_space<vmem>>, vector<1x32x128xf32>
    %50 = vector.shape_cast %49 : vector<1x32x128xf32> to vector<32x128xf32>
    %c0_26 = arith.constant 0 : index
    %51 = memref.load %arg2[%c0_26] : memref<9xf32, #tpu.memory_space<smem>>
    %52 = vector.broadcast %51 : f32 to vector<32x128xf32>
    %53 = arith.mulf %50, %52 : vector<32x128xf32>
    %54 = arith.addf %48, %53 : vector<32x128xf32>
    %cst_27 = arith.constant 0.000000e+00 : f32
    %55 = vector.broadcast %cst_27 : f32 to vector<32x128xf32>
    %56 = arith.subf %55, %54 : vector<32x128xf32>
    %57 = math.exp %56 : vector<32x128xf32>
    %cst_28 = arith.constant 1.000000e+00 : f32
    %58 = vector.broadcast %cst_28 : f32 to vector<32x128xf32>
    %59 = arith.addf %58, %57 : vector<32x128xf32>
    %60 = tpu.reciprocal %59 {approx = true} : vector<32x128xf32> -> vector<32x128xf32>
    %61 = arith.mulf %54, %60 : vector<32x128xf32>
    %c0_29 = arith.constant 0 : index
    %c0_30 = arith.constant 0 : index
    %c0_31 = arith.constant 0 : index
    %62 = vector.load %arg3[%c0_29, %c0_30, %c0_31] : memref<1x32x128xf32, #tpu.memory_space<vmem>>, vector<1x32x128xf32>
    %63 = vector.shape_cast %62 : vector<1x32x128xf32> to vector<32x128xf32>
    %64 = vector.shape_cast %61 : vector<32x128xf32> to vector<1x32x128xf32>
    tpu.vector_store %arg3[%c0_29, %c0_30, %c0_31], %64 {strides = array<i32>} : memref<1x32x128xf32, #tpu.memory_space<vmem>>, vector<1x32x128xf32>,
    return
  }
  func.func @transform_0(%arg0: i32) -> (i32, i32, i32) {
    %c0_i32 = arith.constant 0 : i32
    %c0_i32_0 = arith.constant 0 : i32
    %c0_i32_1 = arith.constant 0 : i32
    return %arg0, %c0_i32, %c0_i32_0 : i32, i32, i32
  }
  func.func @transform_1(%arg0: i32) -> i32 {
    %c0_i32 = arith.constant 0 : i32
    %c0_i32_0 = arith.constant 0 : i32
    return %c0_i32 : i32
  }
  func.func @transform_2(%arg0: i32) -> (i32, i32, i32) {
    %c0_i32 = arith.constant 0 : i32
    %c0_i32_0 = arith.constant 0 : i32
    %c0_i32_1 = arith.constant 0 : i32
    return %arg0, %c0_i32, %c0_i32_0 : i32, i32, i32
  }
}

</mosaic_0001>

<bundles_post_ra>
// kernel: model_forward.1
= control target key start
LH: loop header
LB: loop body
LE: loop exit
PB: predicated region body
PF: predicated region fallthrough
CT: control target
= control target key end

     0   :  { %7 = vsyncpa [#allocation3], 0  ;;  %s826_s9 = smov 0   ;;  %s1073_s0 = inlined_call_operand.vmem [shape: f32[2,40,256], index: 0, kind: input, shape index: {}]   ;;  %s1074_s1 = inlined_call_operand.vmem [shape: f32[9], index: 1, kind: input, shape index: {}]   ;;  %s1075_s2 = inlined_call_operand.vmem [shape: f32[2,32,128], index: 2, kind: output, shape index: {}]  }
   0x1 LB: > { %s722_s10 = sadd.s32 4294967295, %s806_s9   ;;  %p724_p0 = scmp.ge.s32.totalorder %s806_s9, 1  ;;  %s806_s9 = sphi %s826_s9, %s13_s9  }
   0x2   : > { %p91_p1 = scmp.lt.s32.totalorder %s806_s9, 3  ;;  %s103_s13 = sshll.u32 %s1074_s1, 4  ;;  %s104_s13 = int_to_ptr.vmem [resolvable:$true] %s103_s13 }
   0x3   : > { %p752_p3 = scmp.eq.s32.totalorder %s722_s10, 0  ;;  %s808_s14 = smov [#allocation2]  }
   0x4   : > { %p92_p2 = pnand %p724_p0, %p91_p1 }
   0x6   : > { %p748_p4 = pneg %p92_p2  ;;  %124 = sbr.rel (%p92_p2) target bundleno = 286 (0x11e), region = 28 }
   0x8   : > { %p749_p5 = pnand %p752_p3, %p748_p4 }
   0xa   : > { %751 = dma.vmem_to_smem (!%p749_p5), %s104_s13, 16, %s808_s14, [#allocation3]  }
   0xb   : > { %801 = dma.done.wait (%p752_p3), [#allocation3], 16  }
   0xc   : > { %803 = vsyncadd (%p752_p3), [#allocation3], 4294967280 }
   0xd   : > { %131 = sfence }
   0xe   : > { %p148_p6 = scmp.lt.s32.totalorder %s722_s10, 1  ;;  %s733_s15 = sld [smem:[#allocation2 + $0x7]]  ;;  %vm291_vm0 = vcmask 1046528   ;;  %vm469_vm1 = vcmask 1045504   ;;  %vm214_vm2 = vcmask 1039360   ;;  %vm261_vm3 = vcmask 1031168  }
   0xf   : > { %s809_s20 = smov 127   ;;  %s734_s21 = sld [smem:[#allocation2 + $0x6]] }
  0x10   : > { %s1077_s10 = smov (!%p148_p6, %s722_s10), 1  ;;  %s810_s22 = smov 126  }
  0x11   : > { %s743_s16 = smul.u32 80, %s1077_s10  ;;  %s736_s23 = sld [smem:[#allocation2 + $0x4]] }
  0x12   : > { %s737_s24 = sld [smem:[#allocation2 + $0x3]]  ;;  %s742_s30 = sshll.u32 %s1077_s10, 5 }
  0x13   : > { %s843_s19 = scalar_lea.vmem %s1073_s0, %s743_s16  ;;  %s739_s25 = sld [smem:[#allocation2 + $0x1]] }
  0x14   : > { %v181_v0 = vstv %s733_s15  ;;  %v846_v1 = vld [vmem:[%s843_s19 + $0x10] sm:$0xff]  ;;  %v849_v2 = vld [vmem:[%s843_s19] sm:$0xff]  ;;  %v860_v7 = vld [vmem:[%s843_s19 + $0x18] sm:$0xff]  ;;  %s559_s26 = sld [smem:[#allocation2]]  ;;  %s157_s5 = scalar_lea.vmem %s1075_s2, %s742_s30 }
  0x15   : > { %v184_v3 = vmul.f32 %v181_v0, %v846_v1  ;;  %v182_v4 = vmul.f32 %v181_v0, %v849_v2  ;;  %v854_v5 = vld [vmem:[%s843_s19 + $0x20] sm:$0xff]  ;;  %v173_v8 = vld [vmem:[%s843_s19 + $0x8] sm:$0xff]  ;;  %v185_v10 = vmul.f32 %v181_v0, %v860_v7  ;;  %v872_v13 = vld [vmem:[%s843_s19 + $0x38] sm:$0xff]  ;;  %v228_v15 = vstv %s734_s21  ;;  %s732_s27 = sld [smem:[#allocation2 + $0x8]] }
  0x16   : > { %v186_v6 = vmul.f32 %v181_v0, %v854_v5  ;;  %v865_v9 = vld [vmem:[%s843_s19 + $0x28] sm:$0xff]  ;;  %v183_v11 = vmul.f32 %v181_v0, %v173_v8  ;;  %v875_v14 = vld [vmem:[%s843_s19 + $0x30] sm:$0xff]  ;;  %v189_v16 = vmul.f32 %v181_v0, %v872_v13  ;;  %v229_v18 = vmul.f32 %v228_v15, %v849_v2  ;;  %v309_v22 = vld [vmem:[%s843_s19] sm:$0xfe]  ;;  %s735_s28 = sld [smem:[#allocation2 + $0x5]] }
  0x17   : > { %202 = vrot.lane.b32.xlu1 %v184_v3, %s809_s20  ;;  %198 = vrot.lane.b32.xlu0 %v182_v4, %s809_s20  ;;  %v187_v12 = vmul.f32 %v181_v0, %v865_v9  ;;  %v188_v17 = vmul.f32 %v181_v0, %v875_v14  ;;  %v231_v19 = vmul.f32 %v228_v15, %v846_v1  ;;  %v320_v23 = vstv %s736_s23  ;;  %v310_v24 = vld [vmem:[%s843_s19 + $0x8] sm:$0xfe]  ;;  %s738_s29 = sld [smem:[#allocation2 + $0x2]] }
  0x18   : > { %206 = vrot.lane.b32.xlu2 %v186_v6, %s809_s20  ;;  %v230_v20 = vmul.f32 %v228_v15, %v173_v8  ;;  %v232_v21 = vmul.f32 %v228_v15, %v860_v7  ;;  %v233_v25 = vmul.f32 %v228_v15, %v854_v5  ;;  %v234_v26 = vmul.f32 %v228_v15, %v865_v9  ;;  %v317_v44 = vld [vmem:[%s843_s19 + $0x40] sm:$0x1]  ;;  %v318_v45 = vld [vmem:[%s843_s19 + $0x48] sm:$0x1] }
  0x19   : > { %v321_v27 = vmul.f32 %v320_v23, %v309_v22  ;;  %v323_v28 = vmul.f32 %v320_v23, %v846_v1  ;;  %v235_v29 = vmul.f32 %v228_v15, %v875_v14  ;;  %v322_v30 = vmul.f32 %v320_v23, %v310_v24 }
  0x1a   : > { %v324_v31 = vmul.f32 %v320_v23, %v860_v7  ;;  %v236_v35 = vmul.f32 %v228_v15, %v872_v13  ;;  %v326_v38 = vmul.f32 %v320_v23, %v865_v9  ;;  %v325_v39 = vmul.f32 %v320_v23, %v854_v5 }
  0x1b   : > { %v341_v32 = vrot.slane %v321_v27, 1  ;;  %v342_v33 = vrot.slane %v323_v28, 1  ;;  %v344_v34 = vrot.slane %v322_v30, 1  ;;  %v327_v41 = vmul.f32 %v320_v23, %v875_v14 }
  0x1c   : > { %v345_v36 = vrot.slane %v324_v31, 1  ;;  %v349_v42 = vrot.slane %v326_v38, 1  ;;  %v347_v43 = vrot.slane %v325_v39, 1  ;;  %v329_v46 = vmul.f32 %v320_v23, %v317_v44 }
  0x1d   : > { %v343_v37 = vsel %vm291_vm0, %v341_v32, %v342_v33  ;;  %v351_v47 = vrot.slane %v327_v41, 1  ;;  %v328_v48 = vmul.f32 %v320_v23, %v872_v13  ;;  %v330_v52 = vmul.f32 %v320_v23, %v318_v45 }
  0x1e   : > { %v346_v40 = vsel %vm291_vm0, %v344_v34, %v345_v36  ;;  %v350_v49 = vsel %vm291_vm0, %v345_v36, %v349_v42  ;;  %v348_v50 = vsel %vm291_vm0, %v342_v33, %v347_v43  ;;  %v355_v53 = vrot.slane %v329_v46, 1  ;;  %v488_v33 = vld [vmem:[%s843_s19 + $0x8] sm:$0xfc]  ;;  %v489_v46 = vld [vmem:[%s843_s19 + $0x40] sm:$0x3] }
  0x1f   : > { %204 = vrot.lane.b32.xlu1 %v185_v10, %s809_s20  ;;  %200 = vrot.lane.b32.xlu0 %v183_v11, %s809_s20  ;;  %v352_v51 = vsel %vm291_vm0, %v347_v43, %v351_v47  ;;  %v353_v54 = vrot.slane %v328_v48, 1  ;;  %v388_v55 = vstv %s737_s24  ;;  %v357_v56 = vrot.slane %v330_v52, 1 }
  0x20   : > { %208 = vrot.lane.b32.xlu2 %v187_v12, %s809_s20  ;;  %v356_v57 = vsel %vm291_vm0, %v351_v47, %v355_v53  ;;  %v390_v59 = vmul.f32 %v388_v55, %v310_v24  ;;  %v392_v60 = vmul.f32 %v388_v55, %v860_v7  ;;  %v389_v61 = vmul.f32 %v388_v55, %v309_v22 }
  0x21   : > { %v354_v58 = vsel %vm291_vm0, %v349_v42, %v353_v54  ;;  %v391_v62 = vmul.f32 %v388_v55, %v846_v1  ;;  %v358_v63 = vsel %vm291_vm0, %v353_v54, %v357_v56  ;;  %v393_v0 = vmul.f32 %v388_v55, %v854_v5 }
  0x22   : > { %v412_v3 = vrot.slane %v390_v59, 1  ;;  %v413_v4 = vrot.slane %v392_v60, 1  ;;  %v409_v6 = vrot.slane %v389_v61, 1  ;;  %v395_v15 = vmul.f32 %v388_v55, %v875_v14 }
  0x23   : > { %v410_v8 = vrot.slane %v391_v62, 1  ;;  %v415_v10 = vrot.slane %v393_v0, 1  ;;  %v398_v22 = vmul.f32 %v388_v55, %v318_v45  ;;  %v397_v24 = vmul.f32 %v388_v55, %v317_v44 }
  0x24   : > { %v414_v11 = vsel %vm291_vm0, %v412_v3, %v413_v4  ;;  %v492_v27 = vstv %s739_s25  ;;  %v560_v56 = vstv %s559_s26 }
  0x25   : > { %v411_v12 = vsel %vm291_vm0, %v409_v6, %v410_v8  ;;  %v425_v30 = vrot.slane %v398_v22, 1  ;;  %v423_v31 = vrot.slane %v397_v24, 1  ;;  %v495_v32 = vmul.f32 %v492_v27, %v846_v1 }
  0x26   : > { %v497_v38 = vmul.f32 %v492_v27, %v854_v5  ;;  %v494_v39 = vmul.f32 %v492_v27, %v488_v33  ;;  %v498_v42 = vmul.f32 %v492_v27, %v865_v9  ;;  %v500_v47 = vmul.f32 %v492_v27, %v872_v13 }
  0x27   : > { %212 = vrot.lane.b32.xlu1 %v189_v16, %s809_s20  ;;  %210 = vrot.lane.b32.xlu0 %v188_v17, %s809_s20  ;;  %v394_v16 = vmul.f32 %v388_v55, %v865_v9  ;;  %v416_v17 = vsel %vm291_vm0, %v410_v8, %v415_v10  ;;  %v501_v53 = vmul.f32 %v492_v27, %v489_v46 }
  0x28   : > { %245 = vrot.lane.b32.xlu2 %v229_v18, %s810_s22  ;;  %v396_v18 = vmul.f32 %v388_v55, %v872_v13  ;;  %v519_v43 = vrot.slane %v497_v38, 2  ;;  %v516_v44 = vrot.slane %v494_v39, 2  ;;  %v521_v48 = vrot.slane %v498_v42, 2 }
  0x29   : > { %v525_v54 = vrot.slane %v500_v47, 2  ;;  %v564_v6 = vmul.f32 %v560_v56, %v860_v7  ;;  %v567_v22 = vmul.f32 %v560_v56, %v875_v14 }
  0x2a   : > { %v421_v23 = vrot.slane %v396_v18, 1 }
  0x2b   : > { %v526_v60 = vsel %vm469_vm1, %v521_v48, %v525_v54 }
  0x2f   : > { %249 = vrot.lane.b32.xlu1 %v231_v19, %s810_s22  ;;  %247 = vrot.lane.b32.xlu0 %v230_v20, %s810_s22  ;;  %v419_v19 = vrot.slane %v395_v15, 1  ;;  %v417_v20 = vrot.slane %v394_v16, 1  ;;  %v585_v16 = vrot.slane %v564_v6, 2 }
  0x30   : > { %251 = vrot.lane.b32.xlu2 %v232_v21, %s810_s22  ;;  %v487_v21 = vld [vmem:[%s843_s19] sm:$0xfc] }
  0x31   : > { %v422_v28 = vsel %vm291_vm0, %v417_v20, %v421_v23  ;;  %v424_v36 = vsel %vm291_vm0, %v419_v19, %v423_v31  ;;  %v561_v62 = vmul.f32 %v560_v56, %v487_v21 }
  0x33   : > { %v581_v8 = vrot.slane %v561_v62, 2 }
  0x37   : > { %255 = vrot.lane.b32.xlu1 %v234_v26, %s810_s22  ;;  %253 = vrot.lane.b32.xlu0 %v233_v25, %s810_s22  ;;  %v420_v25 = vsel %vm291_vm0, %v415_v10, %v419_v19  ;;  %v418_v26 = vsel %vm291_vm0, %v413_v4, %v417_v20  ;;  %v562_v4 = vmul.f32 %v560_v56, %v488_v33 }
  0x38   : > { %257 = vrot.lane.b32.xlu2 %v235_v29, %s810_s22  ;;  %v493_v29 = vmul.f32 %v492_v27, %v487_v21  ;;  %v566_v20 = vmul.f32 %v560_v56, %v865_v9  ;;  %v565_v21 = vmul.f32 %v560_v56, %v854_v5 }
  0x3a   : > { %v513_v34 = vrot.slane %v493_v29, 2  ;;  %v587_v24 = vrot.slane %v565_v21, 2  ;;  %v568_v29 = vmul.f32 %v560_v56, %v872_v13 }
  0x3c   : > { %v593_v33 = vrot.slane %v568_v29, 2 }
  0x3f   : > { %359 = vrot.lane.b32.xlu1 %v343_v37, %s809_s20  ;;  %259 = vrot.lane.b32.xlu0 %v236_v35, %s810_s22  ;;  %v426_v35 = vsel %vm291_vm0, %v421_v23, %v425_v30  ;;  %v514_v37 = vrot.slane %v495_v32, 2  ;;  %v589_v23 = vrot.slane %v566_v20, 2 }
  0x40   : > { %361 = vrot.lane.b32.xlu2 %v346_v40, %s809_s20  ;;  %v496_v40 = vmul.f32 %v492_v27, %v860_v7 }
  0x41   : > { %v515_v41 = vsel %vm469_vm1, %v513_v34, %v514_v37  ;;  %v594_v39 = vsel %vm469_vm1, %v589_v23, %v593_v33 }
  0x42   : > { %v517_v45 = vrot.slane %v496_v40, 2 }
  0x44   : > { %v522_v52 = vsel %vm469_vm1, %v517_v45, %v521_v48 }
  0x47   : > { %365 = vrot.lane.b32.xlu1 %v350_v49, %s809_s20  ;;  %363 = vrot.lane.b32.xlu0 %v348_v50, %s809_s20  ;;  %v520_v49 = vsel %vm469_vm1, %v514_v37, %v519_v43  ;;  %v518_v50 = vsel %vm469_vm1, %v516_v44, %v517_v45 }
  0x48   : > { %367 = vrot.lane.b32.xlu2 %v352_v51, %s809_s20  ;;  %v499_v51 = vmul.f32 %v492_v27, %v875_v14 }
  0x4a   : > { %v523_v55 = vrot.slane %v499_v51, 2 }
  0x4c   : > { %v524_v61 = vsel %vm469_vm1, %v519_v43, %v523_v55 }
  0x4f   : > { %371 = vrot.lane.b32.xlu1 %v356_v57, %s809_s20  ;;  %369 = vrot.lane.b32.xlu0 %v354_v58, %s809_s20  ;;  %v490_v57 = vld [vmem:[%s843_s19 + $0x48] sm:$0x3]  ;;  %v527_v58 = vrot.slane %v501_v53, 2 }
  0x50   : > { %373 = vrot.lane.b32.xlu2 %v358_v63, %s809_s20  ;;  %v563_v63 = vmul.f32 %v560_v56, %v846_v1  ;;  %v502_v0 = vmul.f32 %v492_v27, %v490_v57  ;;  %v590_v27 = vsel %vm469_vm1, %v585_v16, %v589_v23  ;;  %v570_v31 = vmul.f32 %v560_v56, %v490_v57 }
  0x51   : > { %v528_v3 = vsel %vm469_vm1, %v523_v55, %v527_v58 }
  0x52   : > { %v582_v10 = vrot.slane %v563_v63, 2 }
  0x54   : > { %v583_v18 = vsel %vm469_vm1, %v581_v8, %v582_v10  ;;  %v588_v9 = vsel %vm469_vm1, %v582_v10, %v587_v24 }
  0x57   : > { %429 = vrot.lane.b32.xlu1 %v414_v11, %s810_s22  ;;  %427 = vrot.lane.b32.xlu0 %v411_v12, %s810_s22  ;;  %v529_v11 = vrot.slane %v502_v0, 2  ;;  %v584_v12 = vrot.slane %v562_v4, 2 }
  0x58   : > { %431 = vrot.lane.b32.xlu2 %v416_v17, %s810_s22 }
  0x59   : > { %v530_v19 = vsel %vm469_vm1, %v525_v54, %v529_v11  ;;  %v586_v7 = vsel %vm469_vm1, %v584_v12, %v585_v16  ;;  %v280_v16 = vstv %s735_s28 }
  0x5f   : > { %435 = vrot.lane.b32.xlu1 %v420_v25, %s810_s22  ;;  %433 = vrot.lane.b32.xlu0 %v418_v26, %s810_s22  ;;  %v591_v26 = vrot.slane %v567_v22, 2 }
  0x60   : > { %437 = vrot.lane.b32.xlu2 %v422_v28, %s810_s22  ;;  %v569_v28 = vmul.f32 %v560_v56, %v489_v46 }
  0x61   : > { %v592_v30 = vsel %vm469_vm1, %v587_v24, %v591_v26 }
  0x62   : > { %v595_v32 = vrot.slane %v569_v28, 2 }
  0x64   : > { %v596_v38 = vsel %vm469_vm1, %v591_v26, %v595_v32 }
  0x67   : > { %441 = vrot.lane.b32.xlu1 %v426_v35, %s810_s22  ;;  %439 = vrot.lane.b32.xlu0 %v424_v36, %s810_s22  ;;  %v597_v36 = vrot.slane %v570_v31, 2 }
  0x68   : > { %531 = vrot.lane.b32.xlu2 %v515_v41, %s809_s20 }
  0x69   : > { %v598_v13 = vsel %vm469_vm1, %v593_v33, %v597_v36 }
  0x6f   : > { %535 = vrot.lane.b32.xlu1 %v520_v49, %s809_s20  ;;  %533 = vrot.lane.b32.xlu0 %v518_v50, %s809_s20  ;;  %v163_v49 = vstv %s732_s27 }
  0x70   : > { %537 = vrot.lane.b32.xlu2 %v522_v52, %s809_s20  ;;  %v165_v50 = vmul.f32 %v846_v1, %v163_v49  ;;  %v164_v51 = vmul.f32 %v849_v2, %v163_v49  ;;  %v167_v4 = vmul.f32 %v875_v14, %v163_v49 }
  0x72   : > { %v207_v59 = vpop.permute.xlu2 %206 }
  0x77   : > { %541 = vrot.lane.b32.xlu1 %v526_v60, %s809_s20  ;;  %539 = vrot.lane.b32.xlu0 %v524_v61, %s809_s20  ;;  %v166_v61 = vmul.f32 %v854_v5, %v163_v49 }
  0x78   : > { %543 = vrot.lane.b32.xlu2 %v528_v3, %s809_s20 }
  0x7a   : > { %v209_v15 = vpop.permute.xlu2 %208 }
  0x7b   : > { %v217_v17 = vsel %vm214_vm2, %v207_v59, %v209_v15 }
  0x7c   : > { %v225_v62 = vadd.f32 %v217_v17, %v166_v61  ;;  %v1014_v17 = vmul.f32 %v280_v16, %v875_v14 }
  0x7f   : > { %599 = vrot.lane.b32.xlu1 %v583_v18, %s810_s22  ;;  %545 = vrot.lane.b32.xlu0 %v530_v19, %s809_s20  ;;  %v283_v18 = vmul.f32 %v280_v16, %v854_v5 }
  0x80   : > { %601 = vrot.lane.b32.xlu2 %v586_v7, %s810_s22  ;;  %v297_v7 = vrot.slane %v1014_v17, 1 }
  0x81   : > { %v295_v22 = vrot.slane %v283_v18, 1 }
  0x82   : > { %v246_v25 = vpop.permute.xlu2 %245 }
  0x83   : > { %v298_v23 = vsel %vm291_vm0, %v295_v22, %v297_v7 }
  0x87   : > { %605 = vrot.lane.b32.xlu1 %v590_v27, %s810_s22  ;;  %603 = vrot.lane.b32.xlu0 %v588_v9, %s810_s22 }
  0x88   : > { %607 = vrot.lane.b32.xlu2 %v592_v30, %s810_s22 }
  0x89   : > { %v203_v34 = vpop.permute.xlu1 %202  ;;  %v199_v35 = vpop.permute.xlu0 %198 }
  0x8a   : > { %v252_v37 = vpop.permute.xlu2 %251 }
  0x8f   : > { %611 = vrot.lane.b32.xlu1 %v596_v38, %s810_s22  ;;  %609 = vrot.lane.b32.xlu0 %v594_v39, %s810_s22  ;;  %v282_v39 = vmul.f32 %v280_v16, %v846_v1 }
  0x90   : > { %613 = vrot.lane.b32.xlu2 %v598_v13, %s810_s22 }
  0x91   : > { %v205_v40 = vpop.permute.xlu1 %204  ;;  %v201_v41 = vpop.permute.xlu0 %200 }
  0x92   : > { %v216_v42 = vsel %vm214_vm2, %v203_v34, %v205_v40  ;;  %v215_v43 = vsel %vm214_vm2, %v199_v35, %v201_v41  ;;  %v258_v44 = vpop.permute.xlu2 %257  ;;  %v274_v35 = vld [vmem:[%s843_s19] sm:$0xfe]  ;;  %v293_v40 = vrot.slane %v282_v39, 1 }
  0x93   : > { %v224_v52 = vadd.f32 %v216_v42, %v165_v50  ;;  %v223_v53 = vadd.f32 %v215_v43, %v164_v51  ;;  %v281_v38 = vmul.f32 %v280_v16, %v274_v35  ;;  %v458_v43 = vstv %s738_s29 }
  0x95   : > { %v292_v13 = vrot.slane %v281_v38, 1 }
  0x99   : > { %v213_v45 = vpop.permute.xlu1 %212  ;;  %v211_v46 = vpop.permute.xlu0 %210 }
  0x9a   : > { %v218_v47 = vsel %vm214_vm2, %v211_v46, %v213_v45  ;;  %v997_v48 = vpop.permute.xlu2 %361  ;;  %v294_v46 = vsel %vm291_vm0, %v292_v13, %v293_v40 }
  0x9b   : > { %v226_v8 = vadd.f32 %v218_v47, %v167_v4  ;;  %v460_v47 = vmul.f32 %v458_v43, %v846_v1  ;;  %v461_v1 = vmul.f32 %v458_v43, %v854_v5 }
  0xa1   : > { %v250_v54 = vpop.permute.xlu1 %249  ;;  %v248_v55 = vpop.permute.xlu0 %247 }
  0xa2   : > { %v263_v56 = vsel %vm261_vm3, %v250_v54, %v252_v37  ;;  %v262_v57 = vsel %vm261_vm3, %v246_v25, %v248_v55  ;;  %v368_v60 = vpop.permute.xlu2 %367 }
  0xa3   : > { %v1003_v58 = vadd.f32 %v263_v56, %v224_v52  ;;  %v270_v59 = vadd.f32 %v262_v57, %v223_v53  ;;  %v471_v53 = vrot.slane %v460_v47, 2  ;;  %v278_v56 = vld [vmem:[%s843_s19 + $0x40] sm:$0x1] }
  0xa5   : > { %v305_v51 = vadd.f32 %v294_v46, %v270_v59 }
  0xa9   : > { %v256_v63 = vpop.permute.xlu1 %255  ;;  %v254_v0 = vpop.permute.xlu0 %253 }
  0xaa   : > { %v264_v2 = vsel %vm261_vm3, %v254_v0, %v256_v63  ;;  %v1008_v6 = vpop.permute.xlu2 %373  ;;  %v296_v63 = vsel %vm291_vm0, %v293_v40, %v295_v22  ;;  %v285_v0 = vmul.f32 %v280_v16, %v278_v56  ;;  %v456_v22 = vld [vmem:[%s843_s19 + $0x40] sm:$0x3] }
  0xab   : > { %v272_v3 = vadd.f32 %v264_v2, %v225_v62 }
  0xad   : > { %v307_v26 = vadd.f32 %v298_v23, %v272_v3  ;;  %v306_v3 = vadd.f32 %v296_v63, %v1003_v58  ;;  %v462_v58 = vmul.f32 %v458_v43, %v875_v14 }
  0xaf   : > { %v475_v39 = vrot.slane %v462_v58, 2 }
  0xb1   : > { %v360_v10 = vpop.permute.xlu1 %359  ;;  %v260_v11 = vpop.permute.xlu0 %259 }
  0xb2   : > { %v265_v12 = vsel %vm261_vm3, %v258_v44, %v260_v11  ;;  %v432_v19 = vpop.permute.xlu2 %431  ;;  %v455_v44 = vld [vmem:[%s843_s19] sm:$0xfc]  ;;  %v375_v50 = vsel %vm214_vm2, %v360_v10, %v997_v48  ;;  %v473_v11 = vrot.slane %v461_v1, 2 }
  0xb3   : > { %v1011_v15 = vadd.f32 %v265_v12, %v226_v8  ;;  %v459_v49 = vmul.f32 %v458_v43, %v455_v44  ;;  %v383_v55 = vadd.f32 %v375_v50, %v305_v51  ;;  %v299_v8 = vrot.slane %v285_v0, 1 }
  0xb5   : > { %v470_v54 = vrot.slane %v459_v49, 2 }
  0xb7   : > { %v472_v2 = vsel %vm469_vm1, %v470_v54, %v471_v53 }
  0xb9   : > { %v366_v20 = vpop.permute.xlu1 %365  ;;  %v364_v21 = vpop.permute.xlu0 %363 }
  0xba   : > { %v1022_v9 = vpop.permute.xlu2 %437  ;;  %v376_v48 = vsel %vm214_vm2, %v364_v21, %v366_v20  ;;  %v300_v20 = vsel %vm291_vm0, %v297_v7, %v299_v8  ;;  %v474_v21 = vsel %vm469_vm1, %v471_v53, %v473_v11 }
  0xbb   : > { %v384_v12 = vadd.f32 %v376_v48, %v306_v3 }
  0xc1   : > { %v1019_v24 = vpop.permute.xlu1 %371  ;;  %v370_v25 = vpop.permute.xlu0 %369 }
  0xc2   : > { %v377_v27 = vsel %vm214_vm2, %v368_v60, %v370_v25  ;;  %v532_v31 = vpop.permute.xlu2 %531 }
  0xc3   : > { %v1024_v28 = vadd.f32 %v377_v27, %v307_v26  ;;  %v463_v26 = vmul.f32 %v458_v43, %v456_v22 }
  0xc5   : > { %v477_v14 = vrot.slane %v463_v26, 2 }
  0xc9   : > { %v430_v29 = vpop.permute.xlu1 %429  ;;  %v428_v30 = vpop.permute.xlu0 %427 }
  0xca   : > { %v538_v34 = vpop.permute.xlu2 %537  ;;  %v443_v52 = vsel %vm261_vm3, %v428_v30, %v430_v29 }
  0xcb   : > { %v451_v61 = vadd.f32 %v443_v52, %v383_v55 }
  0xcd   : > { %v483_v4 = vadd.f32 %v472_v2, %v451_v61 }
  0xd1   : > { %v436_v32 = vpop.permute.xlu1 %435  ;;  %v434_v33 = vpop.permute.xlu0 %433 }
  0xd2   : > { %v1028_v41 = vpop.permute.xlu2 %543  ;;  %v444_v10 = vsel %vm261_vm3, %v432_v19, %v434_v33  ;;  %v378_v19 = vsel %vm214_vm2, %v1019_v24, %v1008_v6  ;;  %v445_v7 = vsel %vm261_vm3, %v436_v32, %v1022_v9 }
  0xd3   : > { %v452_v23 = vadd.f32 %v444_v10, %v384_v12  ;;  %v453_v24 = vadd.f32 %v445_v7, %v1024_v28 }
  0xd5   : > { %v484_v33 = vadd.f32 %v474_v21, %v452_v23 }
  0xd9   : > { %v442_v36 = vpop.permute.xlu1 %441  ;;  %v440_v37 = vpop.permute.xlu0 %439 }
  0xda   : > { %v602_v62 = vpop.permute.xlu2 %601  ;;  %v446_v38 = vsel %vm261_vm3, %v440_v37, %v442_v36 }
  0xe1   : > { %v536_v42 = vpop.permute.xlu1 %535  ;;  %v534_v45 = vpop.permute.xlu0 %533 }
  0xe2   : > { %v547_v59 = vsel %vm214_vm2, %v532_v31, %v534_v45  ;;  %v608_v29 = vpop.permute.xlu2 %607  ;;  %v548_v30 = vsel %vm214_vm2, %v536_v42, %v538_v34  ;;  %v308_v31 = vadd.f32 %v300_v20, %v1011_v15  ;;  %v476_v42 = vsel %vm469_vm1, %v473_v11, %v475_v39 }
  0xe3   : > { %v555_v17 = vadd.f32 %v547_v59, %v483_v4  ;;  %v556_v40 = vadd.f32 %v548_v30, %v484_v33  ;;  %v478_v45 = vsel %vm469_vm1, %v475_v39, %v477_v14  ;;  %v485_v46 = vadd.f32 %v476_v42, %v453_v24 }
  0xe4   : > { %v386_v13 = vadd.f32 %v378_v19, %v308_v31 }
  0xe6   : > { %v454_v34 = vadd.f32 %v446_v38, %v386_v13 }
  0xe8   : > { %v486_v47 = vadd.f32 %v478_v45, %v454_v34 }
  0xe9   : > { %v542_v57 = vpop.permute.xlu1 %541  ;;  %v540_v60 = vpop.permute.xlu0 %539 }
  0xea   : > { %v549_v32 = vsel %vm214_vm2, %v540_v60, %v542_v57  ;;  %v614_v50 = vpop.permute.xlu2 %613 }
  0xeb   : > { %v557_v28 = vadd.f32 %v549_v32, %v485_v46 }
  0xf1   : > { %v600_v18 = vpop.permute.xlu1 %599  ;;  %v546_v16 = vpop.permute.xlu0 %545 }
  0xf2   : > { %v615_v5 = vsel %vm261_vm3, %v600_v18, %v602_v62  ;;  %v550_v36 = vsel %vm214_vm2, %v1028_v41, %v546_v16 }
  0xf3   : > { %v623_v25 = vadd.f32 %v615_v5, %v555_v17  ;;  %v558_v52 = vadd.f32 %v550_v36, %v486_v47 }
  0xf5   : > { %v627_v27 = vsub.f32 0.0, %v623_v25 }
  0xf7   : > { %v631_v35 = vmul.f32 1.442695, %v627_v27 }
  0xf9   : > { %765 = vpow2.f32 %v631_v35  ;;  %v606_v43 = vpop.permute.xlu1 %605  ;;  %v604_v44 = vpop.permute.xlu0 %603 }
  0xfa   : > { %v616_v6 = vsel %vm261_vm3, %v604_v44, %v606_v43 }
  0xfb   : > { %v624_v15 = vadd.f32 %v616_v6, %v556_v40 }
  0xfd   : > { %v628_v9 = vsub.f32 0.0, %v624_v15 }
  0xff   : > { %v766_v37 = vpop.eup %765  ;;  %v633_v49 = vmul.f32 1.442695, %v628_v9 }
 0x100   : > { %v639_v51 = vadd.f32 1.0, %v766_v37 }
 0x101   : > { %767 = vpow2.f32 %v633_v49  ;;  %v612_v53 = vpop.permute.xlu1 %611  ;;  %v610_v54 = vpop.permute.xlu0 %609 }
 0x102   : > { %769 = vrcp.f32 %v639_v51  ;;  %v618_v55 = vsel %vm261_vm3, %v612_v53, %v614_v50  ;;  %v617_v56 = vsel %vm261_vm3, %v608_v29, %v610_v54 }
 0x103   : > { %v626_v57 = vadd.f32 %v618_v55, %v558_v52  ;;  %v625_v60 = vadd.f32 %v617_v56, %v557_v28 }
 0x105   : > { %v630_v41 = vsub.f32 0.0, %v626_v57  ;;  %v629_v61 = vsub.f32 0.0, %v625_v60 }
 0x107   : > { %v768_v62 = vpop.eup %767  ;;  %v637_v63 = vmul.f32 1.442695, %v630_v41  ;;  %v635_v0 = vmul.f32 1.442695, %v629_v61 }
 0x108   : > { %v770_v1 = vpop.eup %769  ;;  %v640_v2 = vadd.f32 1.0, %v768_v62 }
 0x109   : > { %v647_v48 = vmul.f32 %v770_v1, %v623_v25  ;;  %771 = vpow2.f32 %v637_v63 }
 0x10a   : > { %773 = vrcp.f32 %v640_v2 }
 0x10b   : > { %651 = vst [vmem:[%s157_s5] sm:$0xff] %v647_v48  ;;  %775 = vpow2.f32 %v635_v0 }
 0x10f   : > { %v772_v59 = vpop.eup %771 }
 0x110   : > { %v774_v3 = vpop.eup %773  ;;  %v642_v4 = vadd.f32 1.0, %v772_v59 }
 0x111   : > { %v776_v8 = vpop.eup %775  ;;  %v648_v10 = vmul.f32 %v774_v3, %v624_v15 }
 0x112   : > { %777 = vrcp.f32 %v642_v4  ;;  %v641_v11 = vadd.f32 1.0, %v776_v8 }
 0x113   : > { %652 = vst [vmem:[%s157_s5 + $0x8] sm:$0xff] %v648_v10 }
 0x114   : > { %779 = vrcp.f32 %v641_v11 }
 0x118   : > { %v778_v12 = vpop.eup %777 }
 0x119   : > { %v650_v17 = vmul.f32 %v778_v12, %v626_v57 }
 0x11a   : > { %v780_v18 = vpop.eup %779 }
 0x11b   : > { %654 = vst [vmem:[%s157_s5 + $0x18] sm:$0xff] %v650_v17  ;;  %v649_v22 = vmul.f32 %v780_v18, %v625_v60 }
 0x11d   : > { %653 = vst [vmem:[%s157_s5 + $0x10] sm:$0xff] %v649_v22 }
 0x11e PF: > { %s13_s9 = sadd.s32 1, %s806_s9  }
 0x11f   : > { %p10_p7 = scmp.ge.s32.totalorder %s13_s9, 4  }
 0x121   :  { %12 = sbr.rel (!%p10_p7) target bundleno = 1 (0x1), region = 63 }
 0x126   :  { %676 = vsyncpa [#allocation3], 1 }
 0x127   :  { %678 = vsyncpa [#allocation3 + $0x1], 1 }

</bundles_post_ra>
